<compile_context>
chip_gen: v6e
topology: v6e:2x2x1
jax: 0.10.0
libtpu: 0.0.40
codegen_flags: <defaults>
</compile_context>

<pallas_src>
import jax
import jax.numpy as jnp
from jax.experimental import pallas as pl
from jax.experimental.pallas import tpu as pltpu


def _conv3x3_prelu_slab(p_in, band_ref, alpha):
    """3x3 conv (stride 1, pad 1, no bias) + shared-alpha PReLU on a lane-dense slab.

    p_in     : VMEM ref (H+2, W*Ci). Rows [1, H+1) hold the activation slab
               (p[1+y, x*Ci + c] = act[y, x, c]); rows 0 and H+1 are zero (the
               vertical halo). The horizontal halo is folded into the banded
               weight matrices, so no lane shifts / rolls / masks are needed.
    band_ref : VMEM ref (3, W*Ci, W*Co); band_ref[ky] is the banded weight for
               vertical tap ky (see _band_weights).
    alpha    : scalar PReLU slope (single shared parameter).
    returns  : (H, W*Co) f32 lane-dense output slab.
    """
    H = p_in.shape[0] - 2
    acc = jnp.dot(p_in[0:H, :], band_ref[0], preferred_element_type=jnp.float32)
    acc = acc + jnp.dot(p_in[1:H + 1, :], band_ref[1],
                        preferred_element_type=jnp.float32)
    acc = acc + jnp.dot(p_in[2:H + 2, :], band_ref[2],
                        preferred_element_type=jnp.float32)
    return jnp.where(acc > 0, acc, alpha * acc)


def _zero_halo_rows(p_ref):
    """Zero only the top / bottom vertical-halo rows of a padded slab scratch."""
    rows, cols = p_ref.shape
    z = jnp.zeros((1, cols), jnp.float32)
    p_ref[0:1, :] = z
    p_ref[rows - 1:rows, :] = z


def _bridge_kernel(x_ref, b1_ref, b2_ref, b3_ref, a_ref, o_ref,
                   p0_ref, p1_ref, p2_ref):
    # x_ref : (1, H, W*Cin)   b*_ref : (3, W*Ci, W*Co)   a_ref : (3,) SMEM
    # o_ref : (1, H, W*c3)    p*_ref : (H+2, W*C) f32 VMEM scratch
    H = x_ref.shape[1]

    # Only the halo rows need zeroing; the interiors are fully overwritten each
    # step. Cheap, and stays correct if the "parallel" batch axis is split
    # across TensorCores (no reliance on program_id==0 running on every core).
    _zero_halo_rows(p0_ref)
    _zero_halo_rows(p1_ref)
    _zero_halo_rows(p2_ref)

    # All stores below are aligned, lane-dense slab stores into scratch/output.
    p0_ref[1:H + 1, :] = x_ref[0].astype(jnp.float32)
    p1_ref[1:H + 1, :] = _conv3x3_prelu_slab(p0_ref, b1_ref, a_ref[0])
    p2_ref[1:H + 1, :] = _conv3x3_prelu_slab(p1_ref, b2_ref, a_ref[1])
    o_ref[0] = _conv3x3_prelu_slab(p2_ref, b3_ref, a_ref[2]).astype(o_ref.dtype)


def _band_weights(w_oihw, W):
    """OIHW 3x3 conv weight -> (3, W*Ci, W*Co) banded matrices (one per ky).

    band[ky][x*Ci + c, x2*Co + co] = w[co, c, ky, x - x2 + 1]  if |x - x2| <= 1
                                   = 0                          otherwise
    With rows_ky[y, x*Ci + c] = in_zeropad[y + ky - 1, x, c]:
        out[y, x2, co] = sum_ky (rows_ky @ band[ky])[y, x2*Co + co]
    i.e. the conv's horizontal zero-padding is folded into the band.
    """
    co, ci, kh, kw = w_oihw.shape
    w_t = jnp.transpose(w_oihw, (2, 3, 1, 0)).astype(jnp.float32)  # (ky,kx,ci,co)
    bands = []
    for ky in range(kh):
        b = jnp.zeros((W, ci, W, co), jnp.float32)
        for kx in range(kw):
            dx = kx - 1                                      # x = x2 + dx
            shift = jnp.eye(W, k=-dx, dtype=jnp.float32)     # [x,x2]=1 iff x==x2+dx
            b = b + shift[:, None, :, None] * w_t[ky, kx][None, :, None, :]
        bands.append(b.reshape(W * ci, W * co))
    return jnp.stack(bands, axis=0)


def bridge_block(x_nchw, params):
    """Forward pass of BridgeBlock. Input/output in PyTorch NCHW layout."""
    N, Cin, H, W = x_nchw.shape
    # NCHW -> NHWC -> lane-dense (N, H, W*Cin) slab (pure layout, done in XLA).
    x = jnp.transpose(x_nchw, (0, 2, 3, 1)).reshape(N, H, W * Cin)

    b1 = _band_weights(params["w1"], W)
    b2 = _band_weights(params["w2"], W)
    b3 = _band_weights(params["w3"], W)
    c1 = params["w1"].shape[0]
    c2 = params["w2"].shape[0]
    c3 = params["w3"].shape[0]
    alphas = jnp.stack(
        [params["a1"], params["a2"], params["a3"]]).astype(jnp.float32)

    out = pl.pallas_call(
        _bridge_kernel,
        out_shape=jax.ShapeDtypeStruct((N, H, W * c3), jnp.float32),
        grid=(N,),
        in_specs=[
            pl.BlockSpec((1, H, W * Cin), lambda n: (n, 0, 0)),
            # Banded weights: constant index_map -> fetched once, VMEM-resident.
            pl.BlockSpec((3, W * Cin, W * c1), lambda n: (0, 0, 0)),
            pl.BlockSpec((3, W * c1, W * c2), lambda n: (0, 0, 0)),
            pl.BlockSpec((3, W * c2, W * c3), lambda n: (0, 0, 0)),
            pl.BlockSpec(memory_space=pltpu.MemorySpace.SMEM),    # shared alphas
        ],
        out_specs=pl.BlockSpec((1, H, W * c3), lambda n: (n, 0, 0)),
        scratch_shapes=[
            # Vertically-padded lane-dense activation slabs, VMEM-resident.
            pltpu.VMEM((H + 2, W * Cin), jnp.float32),
            pltpu.VMEM((H + 2, W * c1), jnp.float32),
            pltpu.VMEM((H + 2, W * c2), jnp.float32),
        ],
        compiler_params=pltpu.CompilerParams(
            dimension_semantics=("parallel",)),
    )(x, b1, b2, b3, alphas)

    out = out.reshape(N, H, W, c3)
    return jnp.transpose(out, (0, 3, 1, 2))                  # NHWC -> NCHW


def init_bridge_params(key, input_channel, output_channel):
    """Deterministic init matching nn.Conv2d / nn.PReLU defaults (shapes only)."""
    c1 = (input_channel * 2 + output_channel) // 3
    c2 = (input_channel + output_channel * 2) // 3
    c3 = output_channel
    keys = jax.random.split(key, 3)

    def conv_w(k, ci, co):
        bound = 1.0 / (ci * 9) ** 0.5
        return jax.random.uniform(k, (co, ci, 3, 3), jnp.float32, -bound, bound)

    return {
        "w1": conv_w(keys[0], input_channel, c1), "a1": jnp.float32(0.25),
        "w2": conv_w(keys[1], c1, c2),            "a2": jnp.float32(0.25),
        "w3": conv_w(keys[2], c2, c3),            "a3": jnp.float32(0.25),
    }


def _reference_bridge_block(x_nchw, params):
    """Pure-JAX reference (lax conv, NCHW) for verification."""
    x = x_nchw
    for i in (1, 2, 3):
        w = params[f"w{i}"]
        x = jax.lax.conv_general_dilated(
            x, w, window_strides=(1, 1), padding=((1, 1), (1, 1)),
            dimension_numbers=("NCHW", "OIHW", "NCHW"))
        a = params[f"a{i}"]
        x = jnp.where(x > 0, x, a * x)
    return x


if __name__ == "__main__":
    key = jax.random.PRNGKey(0)
    k_x, k_p = jax.random.split(key)

    N, Cin, H, W = 2, 4, 16, 16
    Cout = 8
    x = jax.random.normal(k_x, (N, Cin, H, W), jnp.float32)
    params = init_bridge_params(k_p, Cin, Cout)

    out = jax.jit(bridge_block)(x, params)
    out = jax.block_until_ready(out)

    ref = _reference_bridge_block(x, params)
    assert out.shape == (N, Cout, H, W), out.shape
    assert jnp.allclose(out, ref, atol=1e-4, rtol=1e-4), \
        float(jnp.max(jnp.abs(out - ref)))

    print("KERNEL_OK")
</pallas_src>

<mosaic_0001>
module attributes {stable_mosaic.version = 11 : i64} {
  func.func @_bridge_kernel(%arg0: i32, %arg1: memref<1x16x64xf32, #tpu.memory_space<vmem>>, %arg2: memref<3x64x80xf32, #tpu.memory_space<vmem>>, %arg3: memref<3x80x96xf32, #tpu.memory_space<vmem>>, %arg4: memref<3x96x128xf32, #tpu.memory_space<vmem>>, %arg5: memref<3xf32, #tpu.memory_space<smem>>, %arg6: memref<1x16x128xf32, #tpu.memory_space<vmem>>, %arg7: memref<18x64xf32, #tpu.memory_space<vmem>>, %arg8: memref<18x80xf32, #tpu.memory_space<vmem>>, %arg9: memref<18x96xf32, #tpu.memory_space<vmem>>) attributes {dimension_semantics = [#tpu.dimension_semantics<parallel>], iteration_bounds = array<i64: 2>, scalar_prefetch = 0 : i64, scratch_operands = 3 : i64, tpu.core_type = #tpu.core_type<tc>, window_params = [{transform_indices = @transform_0, window_bounds = array<i64: 1, 16, 64>}, {pipeline_mode = #tpu.pipeline_mode<synchronous>, transform_indices = @transform_1, window_bounds = array<i64: 3, 64, 80>}, {pipeline_mode = #tpu.pipeline_mode<synchronous>, transform_indices = @transform_2, window_bounds = array<i64: 3, 80, 96>}, {pipeline_mode = #tpu.pipeline_mode<synchronous>, transform_indices = @transform_3, window_bounds = array<i64: 3, 96, 128>}, {transform_indices = @transform_4, window_bounds = array<i64: 3>}, {transform_indices = @transform_5, window_bounds = array<i64: 1, 16, 128>}]} {
    %cst = arith.constant 0.000000e+00 : f32
    %0 = vector.broadcast %cst : f32 to vector<1x64xf32>
    %c0 = arith.constant 0 : index
    %c0_0 = arith.constant 0 : index
    %1 = vector.load %arg7[%c0, %c0_0] : memref<18x64xf32, #tpu.memory_space<vmem>>, vector<1x64xf32>
    tpu.vector_store %arg7[%c0, %c0_0], %0 {strides = array<i32>} : memref<18x64xf32, #tpu.memory_space<vmem>>, vector<1x64xf32>,
    %c17 = arith.constant 17 : index
    %c0_1 = arith.constant 0 : index
    %2 = vector.load %arg7[%c17, %c0_1] : memref<18x64xf32, #tpu.memory_space<vmem>>, vector<1x64xf32>
    tpu.vector_store %arg7[%c17, %c0_1], %0 {strides = array<i32>} : memref<18x64xf32, #tpu.memory_space<vmem>>, vector<1x64xf32>,
    %cst_2 = arith.constant 0.000000e+00 : f32
    %3 = vector.broadcast %cst_2 : f32 to vector<1x80xf32>
    %c0_3 = arith.constant 0 : index
    %c0_4 = arith.constant 0 : index
    %4 = vector.load %arg8[%c0_3, %c0_4] : memref<18x80xf32, #tpu.memory_space<vmem>>, vector<1x80xf32>
    tpu.vector_store %arg8[%c0_3, %c0_4], %3 {strides = array<i32>} : memref<18x80xf32, #tpu.memory_space<vmem>>, vector<1x80xf32>,
    %c17_5 = arith.constant 17 : index
    %c0_6 = arith.constant 0 : index
    %5 = vector.load %arg8[%c17_5, %c0_6] : memref<18x80xf32, #tpu.memory_space<vmem>>, vector<1x80xf32>
    tpu.vector_store %arg8[%c17_5, %c0_6], %3 {strides = array<i32>} : memref<18x80xf32, #tpu.memory_space<vmem>>, vector<1x80xf32>,
    %cst_7 = arith.constant 0.000000e+00 : f32
    %6 = vector.broadcast %cst_7 : f32 to vector<1x96xf32>
    %c0_8 = arith.constant 0 : index
    %c0_9 = arith.constant 0 : index
    %7 = vector.load %arg9[%c0_8, %c0_9] : memref<18x96xf32, #tpu.memory_space<vmem>>, vector<1x96xf32>
    tpu.vector_store %arg9[%c0_8, %c0_9], %6 {strides = array<i32>} : memref<18x96xf32, #tpu.memory_space<vmem>>, vector<1x96xf32>,
    %c17_10 = arith.constant 17 : index
    %c0_11 = arith.constant 0 : index
    %8 = vector.load %arg9[%c17_10, %c0_11] : memref<18x96xf32, #tpu.memory_space<vmem>>, vector<1x96xf32>
    tpu.vector_store %arg9[%c17_10, %c0_11], %6 {strides = array<i32>} : memref<18x96xf32, #tpu.memory_space<vmem>>, vector<1x96xf32>,
    %c0_12 = arith.constant 0 : index
    %c0_13 = arith.constant 0 : index
    %c0_14 = arith.constant 0 : index
    %9 = vector.load %arg1[%c0_12, %c0_13, %c0_14] : memref<1x16x64xf32, #tpu.memory_space<vmem>>, vector<1x16x64xf32>
    %10 = vector.shape_cast %9 : vector<1x16x64xf32> to vector<16x64xf32>
    %c1 = arith.constant 1 : index
    %c0_15 = arith.constant 0 : index
    %11 = vector.load %arg7[%c1, %c0_15] : memref<18x64xf32, #tpu.memory_space<vmem>>, vector<16x64xf32>
    tpu.vector_store %arg7[%c1, %c0_15], %10 {strides = array<i32>} : memref<18x64xf32, #tpu.memory_space<vmem>>, vector<16x64xf32>,
    %c0_16 = arith.constant 0 : index
    %12 = memref.load %arg5[%c0_16] : memref<3xf32, #tpu.memory_space<smem>>
    %c0_17 = arith.constant 0 : index
    %c0_18 = arith.constant 0 : index
    %13 = vector.load %arg7[%c0_17, %c0_18] : memref<18x64xf32, #tpu.memory_space<vmem>>, vector<16x64xf32>
    %c0_19 = arith.constant 0 : index
    %c0_20 = arith.constant 0 : index
    %c0_21 = arith.constant 0 : index
    %14 = vector.load %arg2[%c0_19, %c0_20, %c0_21] : memref<3x64x80xf32, #tpu.memory_space<vmem>>, vector<1x64x80xf32>
    %15 = vector.shape_cast %14 : vector<1x64x80xf32> to vector<64x80xf32>
    %cst_22 = arith.constant dense<0.000000e+00> : vector<16x80xf32>
    %16 = tpu.matmul %13, %15, %cst_22 {dimension_numbers = #tpu.dot_dimension_numbers<[1], [0], [0], [1], [0, 0, 1, 1], [], []>} : vector<16x64xf32>, vector<64x80xf32>, vector<16x80xf32> -> vector<16x80xf32>
    %c1_23 = arith.constant 1 : index
    %c0_24 = arith.constant 0 : index
    %17 = vector.load %arg7[%c1_23, %c0_24] : memref<18x64xf32, #tpu.memory_space<vmem>>, vector<16x64xf32>
    %c1_25 = arith.constant 1 : index
    %c0_26 = arith.constant 0 : index
    %c0_27 = arith.constant 0 : index
    %18 = vector.load %arg2[%c1_25, %c0_26, %c0_27] : memref<3x64x80xf32, #tpu.memory_space<vmem>>, vector<1x64x80xf32>
    %19 = vector.shape_cast %18 : vector<1x64x80xf32> to vector<64x80xf32>
    %cst_28 = arith.constant dense<0.000000e+00> : vector<16x80xf32>
    %20 = tpu.matmul %17, %19, %cst_28 {dimension_numbers = #tpu.dot_dimension_numbers<[1], [0], [0], [1], [0, 0, 1, 1], [], []>} : vector<16x64xf32>, vector<64x80xf32>, vector<16x80xf32> -> vector<16x80xf32>
    %21 = arith.addf %16, %20 : vector<16x80xf32>
    %c2 = arith.constant 2 : index
    %c0_29 = arith.constant 0 : index
    %22 = vector.load %arg7[%c2, %c0_29] : memref<18x64xf32, #tpu.memory_space<vmem>>, vector<16x64xf32>
    %c2_30 = arith.constant 2 : index
    %c0_31 = arith.constant 0 : index
    %c0_32 = arith.constant 0 : index
    %23 = vector.load %arg2[%c2_30, %c0_31, %c0_32] : memref<3x64x80xf32, #tpu.memory_space<vmem>>, vector<1x64x80xf32>
    %24 = vector.shape_cast %23 : vector<1x64x80xf32> to vector<64x80xf32>
    %cst_33 = arith.constant dense<0.000000e+00> : vector<16x80xf32>
    %25 = tpu.matmul %22, %24, %cst_33 {dimension_numbers = #tpu.dot_dimension_numbers<[1], [0], [0], [1], [0, 0, 1, 1], [], []>} : vector<16x64xf32>, vector<64x80xf32>, vector<16x80xf32> -> vector<16x80xf32>
    %26 = arith.addf %21, %25 : vector<16x80xf32>
    %cst_34 = arith.constant 0.000000e+00 : f32
    %27 = vector.broadcast %cst_34 : f32 to vector<16x80xf32>
    %28 = arith.cmpf ogt, %26, %27 : vector<16x80xf32>
    %29 = vector.broadcast %12 : f32 to vector<16x80xf32>
    %30 = arith.mulf %29, %26 : vector<16x80xf32>
    %31 = arith.select %28, %26, %30 : vector<16x80xi1>, vector<16x80xf32>
    %c1_35 = arith.constant 1 : index
    %c0_36 = arith.constant 0 : index
    %32 = vector.load %arg8[%c1_35, %c0_36] : memref<18x80xf32, #tpu.memory_space<vmem>>, vector<16x80xf32>
    tpu.vector_store %arg8[%c1_35, %c0_36], %31 {strides = array<i32>} : memref<18x80xf32, #tpu.memory_space<vmem>>, vector<16x80xf32>,
    %c1_37 = arith.constant 1 : index
    %33 = memref.load %arg5[%c1_37] : memref<3xf32, #tpu.memory_space<smem>>
    %c0_38 = arith.constant 0 : index
    %c0_39 = arith.constant 0 : index
    %34 = vector.load %arg8[%c0_38, %c0_39] : memref<18x80xf32, #tpu.memory_space<vmem>>, vector<16x80xf32>
    %c0_40 = arith.constant 0 : index
    %c0_41 = arith.constant 0 : index
    %c0_42 = arith.constant 0 : index
    %35 = vector.load %arg3[%c0_40, %c0_41, %c0_42] : memref<3x80x96xf32, #tpu.memory_space<vmem>>, vector<1x80x96xf32>
    %36 = vector.shape_cast %35 : vector<1x80x96xf32> to vector<80x96xf32>
    %cst_43 = arith.constant dense<0.000000e+00> : vector<16x96xf32>
    %37 = tpu.matmul %34, %36, %cst_43 {dimension_numbers = #tpu.dot_dimension_numbers<[1], [0], [0], [1], [0, 0, 1, 1], [], []>} : vector<16x80xf32>, vector<80x96xf32>, vector<16x96xf32> -> vector<16x96xf32>
    %c1_44 = arith.constant 1 : index
    %c0_45 = arith.constant 0 : index
    %38 = vector.load %arg8[%c1_44, %c0_45] : memref<18x80xf32, #tpu.memory_space<vmem>>, vector<16x80xf32>
    %c1_46 = arith.constant 1 : index
    %c0_47 = arith.constant 0 : index
    %c0_48 = arith.constant 0 : index
    %39 = vector.load %arg3[%c1_46, %c0_47, %c0_48] : memref<3x80x96xf32, #tpu.memory_space<vmem>>, vector<1x80x96xf32>
    %40 = vector.shape_cast %39 : vector<1x80x96xf32> to vector<80x96xf32>
    %cst_49 = arith.constant dense<0.000000e+00> : vector<16x96xf32>
    %41 = tpu.matmul %38, %40, %cst_49 {dimension_numbers = #tpu.dot_dimension_numbers<[1], [0], [0], [1], [0, 0, 1, 1], [], []>} : vector<16x80xf32>, vector<80x96xf32>, vector<16x96xf32> -> vector<16x96xf32>
    %42 = arith.addf %37, %41 : vector<16x96xf32>
    %c2_50 = arith.constant 2 : index
    %c0_51 = arith.constant 0 : index
    %43 = vector.load %arg8[%c2_50, %c0_51] : memref<18x80xf32, #tpu.memory_space<vmem>>, vector<16x80xf32>
    %c2_52 = arith.constant 2 : index
    %c0_53 = arith.constant 0 : index
    %c0_54 = arith.constant 0 : index
    %44 = vector.load %arg3[%c2_52, %c0_53, %c0_54] : memref<3x80x96xf32, #tpu.memory_space<vmem>>, vector<1x80x96xf32>
    %45 = vector.shape_cast %44 : vector<1x80x96xf32> to vector<80x96xf32>
    %cst_55 = arith.constant dense<0.000000e+00> : vector<16x96xf32>
    %46 = tpu.matmul %43, %45, %cst_55 {dimension_numbers = #tpu.dot_dimension_numbers<[1], [0], [0], [1], [0, 0, 1, 1], [], []>} : vector<16x80xf32>, vector<80x96xf32>, vector<16x96xf32> -> vector<16x96xf32>
    %47 = arith.addf %42, %46 : vector<16x96xf32>
    %cst_56 = arith.constant 0.000000e+00 : f32
    %48 = vector.broadcast %cst_56 : f32 to vector<16x96xf32>
    %49 = arith.cmpf ogt, %47, %48 : vector<16x96xf32>
    %50 = vector.broadcast %33 : f32 to vector<16x96xf32>
    %51 = arith.mulf %50, %47 : vector<16x96xf32>
    %52 = arith.select %49, %47, %51 : vector<16x96xi1>, vector<16x96xf32>
    %c1_57 = arith.constant 1 : index
    %c0_58 = arith.constant 0 : index
    %53 = vector.load %arg9[%c1_57, %c0_58] : memref<18x96xf32, #tpu.memory_space<vmem>>, vector<16x96xf32>
    tpu.vector_store %arg9[%c1_57, %c0_58], %52 {strides = array<i32>} : memref<18x96xf32, #tpu.memory_space<vmem>>, vector<16x96xf32>,
    %c2_59 = arith.constant 2 : index
    %54 = memref.load %arg5[%c2_59] : memref<3xf32, #tpu.memory_space<smem>>
    %c0_60 = arith.constant 0 : index
    %c0_61 = arith.constant 0 : index
    %55 = vector.load %arg9[%c0_60, %c0_61] : memref<18x96xf32, #tpu.memory_space<vmem>>, vector<16x96xf32>
    %c0_62 = arith.constant 0 : index
    %c0_63 = arith.constant 0 : index
    %c0_64 = arith.constant 0 : index
    %56 = vector.load %arg4[%c0_62, %c0_63, %c0_64] : memref<3x96x128xf32, #tpu.memory_space<vmem>>, vector<1x96x128xf32>
    %57 = vector.shape_cast %56 : vector<1x96x128xf32> to vector<96x128xf32>
    %cst_65 = arith.constant dense<0.000000e+00> : vector<16x128xf32>
    %58 = tpu.matmul %55, %57, %cst_65 {dimension_numbers = #tpu.dot_dimension_numbers<[1], [0], [0], [1], [0, 0, 1, 1], [], []>} : vector<16x96xf32>, vector<96x128xf32>, vector<16x128xf32> -> vector<16x128xf32>
    %c1_66 = arith.constant 1 : index
    %c0_67 = arith.constant 0 : index
    %59 = vector.load %arg9[%c1_66, %c0_67] : memref<18x96xf32, #tpu.memory_space<vmem>>, vector<16x96xf32>
    %c1_68 = arith.constant 1 : index
    %c0_69 = arith.constant 0 : index
    %c0_70 = arith.constant 0 : index
    %60 = vector.load %arg4[%c1_68, %c0_69, %c0_70] : memref<3x96x128xf32, #tpu.memory_space<vmem>>, vector<1x96x128xf32>
    %61 = vector.shape_cast %60 : vector<1x96x128xf32> to vector<96x128xf32>
    %cst_71 = arith.constant dense<0.000000e+00> : vector<16x128xf32>
    %62 = tpu.matmul %59, %61, %cst_71 {dimension_numbers = #tpu.dot_dimension_numbers<[1], [0], [0], [1], [0, 0, 1, 1], [], []>} : vector<16x96xf32>, vector<96x128xf32>, vector<16x128xf32> -> vector<16x128xf32>
    %63 = arith.addf %58, %62 : vector<16x128xf32>
    %c2_72 = arith.constant 2 : index
    %c0_73 = arith.constant 0 : index
    %64 = vector.load %arg9[%c2_72, %c0_73] : memref<18x96xf32, #tpu.memory_space<vmem>>, vector<16x96xf32>
    %c2_74 = arith.constant 2 : index
    %c0_75 = arith.constant 0 : index
    %c0_76 = arith.constant 0 : index
    %65 = vector.load %arg4[%c2_74, %c0_75, %c0_76] : memref<3x96x128xf32, #tpu.memory_space<vmem>>, vector<1x96x128xf32>
    %66 = vector.shape_cast %65 : vector<1x96x128xf32> to vector<96x128xf32>
    %cst_77 = arith.constant dense<0.000000e+00> : vector<16x128xf32>
    %67 = tpu.matmul %64, %66, %cst_77 {dimension_numbers = #tpu.dot_dimension_numbers<[1], [0], [0], [1], [0, 0, 1, 1], [], []>} : vector<16x96xf32>, vector<96x128xf32>, vector<16x128xf32> -> vector<16x128xf32>
    %68 = arith.addf %63, %67 : vector<16x128xf32>
    %cst_78 = arith.constant 0.000000e+00 : f32
    %69 = vector.broadcast %cst_78 : f32 to vector<16x128xf32>
    %70 = arith.cmpf ogt, %68, %69 : vector<16x128xf32>
    %71 = vector.broadcast %54 : f32 to vector<16x128xf32>
    %72 = arith.mulf %71, %68 : vector<16x128xf32>
    %73 = arith.select %70, %68, %72 : vector<16x128xi1>, vector<16x128xf32>
    %c0_79 = arith.constant 0 : index
    %c0_80 = arith.constant 0 : index
    %c0_81 = arith.constant 0 : index
    %74 = vector.load %arg6[%c0_79, %c0_80, %c0_81] : memref<1x16x128xf32, #tpu.memory_space<vmem>>, vector<1x16x128xf32>
    %75 = vector.shape_cast %74 : vector<1x16x128xf32> to vector<16x128xf32>
    %76 = vector.shape_cast %73 : vector<16x128xf32> to vector<1x16x128xf32>
    tpu.vector_store %arg6[%c0_79, %c0_80, %c0_81], %76 {strides = array<i32>} : memref<1x16x128xf32, #tpu.memory_space<vmem>>, vector<1x16x128xf32>,
    return
  }
  func.func @transform_0(%arg0: i32) -> (i32, i32, i32) {
    %c0_i32 = arith.constant 0 : i32
    %c0_i32_0 = arith.constant 0 : i32
    %c0_i32_1 = arith.constant 0 : i32
    return %arg0, %c0_i32, %c0_i32_0 : i32, i32, i32
  }
  func.func @transform_1(%arg0: i32) -> (i32, i32, i32) {
    %c0_i32 = arith.constant 0 : i32
    %c0_i32_0 = arith.constant 0 : i32
    %c0_i32_1 = arith.constant 0 : i32
    %c0_i32_2 = arith.constant 0 : i32
    return %c0_i32, %c0_i32_0, %c0_i32_1 : i32, i32, i32
  }
  func.func @transform_2(%arg0: i32) -> (i32, i32, i32) {
    %c0_i32 = arith.constant 0 : i32
    %c0_i32_0 = arith.constant 0 : i32
    %c0_i32_1 = arith.constant 0 : i32
    %c0_i32_2 = arith.constant 0 : i32
    return %c0_i32, %c0_i32_0, %c0_i32_1 : i32, i32, i32
  }
  func.func @transform_3(%arg0: i32) -> (i32, i32, i32) {
    %c0_i32 = arith.constant 0 : i32
    %c0_i32_0 = arith.constant 0 : i32
    %c0_i32_1 = arith.constant 0 : i32
    %c0_i32_2 = arith.constant 0 : i32
    return %c0_i32, %c0_i32_0, %c0_i32_1 : i32, i32, i32
  }
  func.func @transform_4(%arg0: i32) -> i32 {
    %c0_i32 = arith.constant 0 : i32
    %c0_i32_0 = arith.constant 0 : i32
    return %c0_i32 : i32
  }
  func.func @transform_5(%arg0: i32) -> (i32, i32, i32) {
    %c0_i32 = arith.constant 0 : i32
    %c0_i32_0 = arith.constant 0 : i32
    %c0_i32_1 = arith.constant 0 : i32
    return %arg0, %c0_i32, %c0_i32_0 : i32, i32, i32
  }
}

</mosaic_0001>

<bundles_post_ra>
// kernel: bridge_block.1
= control target key start
LH: loop header
LB: loop body
LE: loop exit
PB: predicated region body
PF: predicated region fallthrough
CT: control target
= control target key end

     0   :  { %10 = vsyncpa [#allocation6], 0  ;;  %s1690_s18 = smov 0   ;;  %s2036_s0 = inlined_call_operand.vmem [shape: f32[2,16,64], index: 0, kind: input, shape index: {}]   ;;  %s2037_s1 = inlined_call_operand.vmem [shape: f32[3,64,80], index: 1, kind: input, shape index: {}]   ;;  %s2038_s2 = inlined_call_operand.vmem [shape: f32[3,80,96], index: 2, kind: input, shape index: {}]   ;;  %s2039_s3 = inlined_call_operand.vmem [shape: f32[3,96,128], index: 3, kind: input, shape index: {}]   ;;  %s2040_s4 = inlined_call_operand.vmem [shape: f32[3], index: 4, kind: input, shape index: {}]   ;;  %s2041_s5 = inlined_call_operand.vmem [shape: f32[2,16,128], index: 5, kind: output, shape index: {}]  }
   0x1 LB: > { %s1696_s19 = sadd.s32 4294967295, %s1656_s18   ;;  %p1203_p0 = scmp.ge.s32.totalorder %s1656_s18, 1  ;;  %s1656_s18 = sphi %s1690_s18, %s16_s18  }
   0x2   : > { %p157_p1 = scmp.lt.s32.totalorder %s1656_s18, 3  ;;  %s179_s22 = sshll.u32 %s2040_s4, 4  ;;  %s180_s22 = int_to_ptr.vmem [resolvable:$true] %s179_s22 }
   0x3   : > { %p1619_p3 = scmp.eq.s32.totalorder %s1696_s19, 0  ;;  %s1631_s24 = scalar_lea.vmem %s180_s22, 16 }
   0x4   : > { %p1703_p2 = pnand %p1203_p0, %p157_p1  ;;  %p1632_p6 = scmp.ne.s32.totalorder %s180_s22, %s1631_s24 }
   0x5   : > { %p1639_p10 = scmp.lt.s32.totalorder %s180_s22, %s180_s22  ;;  %p1640_p11 = scmp.lt.s32.totalorder %s1631_s24, %s1631_s24 }
   0x6   : > { %p1615_p4 = pneg %p1703_p2 }
   0x7   : > { %p1641_p12 = por %p1640_p11, %p1639_p10 }
   0x8   : > { %p1616_p5 = pnand %p1619_p3, %p1615_p4 }
   0xa   : > { %p1633_p7 = pneg %p1616_p5 }
   0xc   : > { %p1634_p8 = pnand %p1633_p7, %p1632_p6 }
   0xe   : > { %p1635_p9 = pneg %p1634_p8 }
  0x10   : > { %p1642_p13 = pnand %p1641_p12, %p1635_p9 }
  0x12   : > { %1645 = shalt.err (!%p1642_p13)
}
  0x13   : > { %s1658_s25 = smov [#allocation5]   ;;  %200 = sbr.rel (%p1703_p2) target bundleno = 725 (0x2d5), region = 40 }
  0x14   : > { %1618 = dma.vmem_to_smem (!%p1616_p5), %s180_s22, 16, %s1658_s25, [#allocation6]  }
  0x18   : > { %1651 = dma.done.wait (%p1619_p3), [#allocation6], 16  }
  0x19   : > { %1653 = vsyncadd (%p1619_p3), [#allocation6], 4294967280 }
  0x1a   : > { %206 = sfence }
  0x1b   : > { %v1219_v0 = vld [vmem:[%s2037_s1 + $0x78] sm:$0xff]  ;;  %v1218_v1 = vld [vmem:[%s2037_s1 + $0x70] sm:$0xff]  ;;  %p229_p0 = scmp.lt.s32.totalorder %s1696_s19, 1  ;;  %vm239_vm0 = vcmask 516096   ;;  %v1217_v2 = vld [vmem:[%s2037_s1 + $0x68] sm:$0xff]  ;;  %v1659_v3 = vmov 0.0  }
  0x1c   : > { %1404 = vmatprep.subr.mxu1 %v1219_v0  ;;  %240 = vst.msk [vmem:[#allocation2] sm:$0x1] %vm239_vm0, %v1659_v3  ;;  %241 = vst.msk [vmem:[#allocation2 + $0x11] sm:$0x1] %vm239_vm0, %v1659_v3  ;;  %v1231_v4 = vld [vmem:[%s2037_s1 + $0xb8] sm:$0xff]  ;;  %v1230_v5 = vld [vmem:[%s2037_s1 + $0xb0] sm:$0xff] }
  0x1d   : > { %1405 = vmatpush3.msra.mxu1 %v1219_v0  ;;  %s2044_s19 = smov (!%p229_p0, %s1696_s19), 1  ;;  %v1216_v6 = vld [vmem:[%s2037_s1 + $0x60] sm:$0xff]  ;;  %vm250_vm1 = vcmask 523264   ;;  %1442 = vmatprep.subr.mxu0 %v1231_v4  ;;  %v1229_v7 = vld [vmem:[%s2037_s1 + $0xa8] sm:$0xff]  ;;  %v1215_v8 = vld [vmem:[%s2037_s1 + $0x58] sm:$0xff]  ;;  %vm242_vm2 = vcmask 647168  }
  0x1e   : > { %1406 = vmatprep.subr.mxu1 %v1218_v1  ;;  %s1294_s13 = sshll.u32 %s2044_s19, 4  ;;  %1443 = vmatpush3.msra.mxu0 %v1231_v4  ;;  %v1228_v11 = vld [vmem:[%s2037_s1 + $0xa0] sm:$0xff]  ;;  %v1214_v12 = vld [vmem:[%s2037_s1 + $0x50] sm:$0xff]  ;;  %v1227_v13 = vld [vmem:[%s2037_s1 + $0x98] sm:$0xff]  ;;  %243 = vst.msk [vmem:[#allocation3] sm:$0x1] %vm242_vm2, %v1659_v3 }
  0x1f   : > { %1407 = vmatpush3.msra.mxu1 %v1218_v1  ;;  %s233_s16 = scalar_lea.vmem %s2036_s0, %s1294_s13  ;;  %1444 = vmatprep.subr.mxu0 %v1230_v5  ;;  %v1213_v14 = vld [vmem:[%s2037_s1 + $0x48] sm:$0xff]  ;;  %v1226_v15 = vld [vmem:[%s2037_s1 + $0x90] sm:$0xff]  ;;  %v1212_v16 = vld [vmem:[%s2037_s1 + $0x40] sm:$0xff]  ;;  %244 = vst.msk [vmem:[#allocation3 + $0x11] sm:$0x1] %vm242_vm2, %v1659_v3  ;;  %s253_s6 = sld [smem:[#allocation5]] }
  0x20   : > { %1408 = vmatprep.subr.mxu1 %v1217_v2  ;;  %v248_v9 = vld [vmem:[%s233_s16] sm:$0xff]  ;;  %v249_v10 = vld [vmem:[%s233_s16 + $0x8] sm:$0xff]  ;;  %1445 = vmatpush3.msra.mxu0 %v1230_v5  ;;  %v263_v19 = vld [vmem:[%s2037_s1 + $0x38] sm:$0xff]  ;;  %vm538_vm4 = vcmask 654336   ;;  %vm245_vm6 = vcmask 778240   ;;  %s1234_s9 = sld [smem:[#allocation5 + $0x1]]  ;;  %s238_s14 = scalar_lea.vmem %s2041_s5, %s1294_s13 }
  0x21   : > { %1409 = vmatpush3.msra.mxu1 %v1217_v2  ;;  %251 = vst.msk [vmem:[#allocation2 + $0x1] sm:$0xff] %vm250_vm1, %v248_v9  ;;  %252 = vst.msk [vmem:[#allocation2 + $0x9] sm:$0xff] %vm250_vm1, %v249_v10  ;;  %1446 = vmatprep.subr.mxu0 %v1229_v7  ;;  %v1225_v20 = vld [vmem:[%s2037_s1 + $0x88] sm:$0xff]  ;;  %v262_v21 = vld [vmem:[%s2037_s1 + $0x30] sm:$0xff]  ;;  %vm832_vm8 = vcmask 785408   ;;  %s1261_s10 = sld [smem:[#allocation5 + $0x2]] }
  0x22   : > { %1410 = vmatprep.subr.mxu1 %v1216_v6  ;;  %1447 = vmatpush3.msra.mxu0 %v1229_v7  ;;  %v1224_v22 = vld [vmem:[%s2037_s1 + $0x80] sm:$0xff]  ;;  %v261_v23 = vld [vmem:[%s2037_s1 + $0x28] sm:$0xff]  ;;  %v259_v28 = vld [vmem:[%s2037_s1 + $0x18] sm:$0xff]  ;;  %246 = vst.msk [vmem:[#allocation4] sm:$0x1] %vm245_vm6, %v1659_v3 }
  0x23   : > { %1411 = vmatpush3.msra.mxu1 %v1216_v6  ;;  %1448 = vmatprep.subr.mxu0 %v1228_v11  ;;  %v260_v25 = vld [vmem:[%s2037_s1 + $0x20] sm:$0xff]  ;;  %v258_v29 = vld [vmem:[%s2037_s1 + $0x10] sm:$0xff]  ;;  %v257_v30 = vld [vmem:[%s2037_s1 + $0x8] sm:$0xff]  ;;  %247 = vst.msk [vmem:[#allocation4 + $0x11] sm:$0x1] %vm245_vm6, %v1659_v3 }
  0x24   : > { %1412 = vmatprep.subr.mxu1 %v1215_v8  ;;  %1449 = vmatpush3.msra.mxu0 %v1228_v11  ;;  %v256_v31 = vld [vmem:[%s2037_s1] sm:$0xff]  ;;  %v1244_v33 = vld [vmem:[%s2038_s2 + $0x98] sm:$0xff]  ;;  %v553_v34 = vld [vmem:[%s2038_s2 + $0x48] sm:$0xff] }
  0x25   : > { %1413 = vmatpush3.msra.mxu1 %v1215_v8  ;;  %1450 = vmatprep.subr.mxu0 %v1227_v13  ;;  %v1243_v35 = vld [vmem:[%s2038_s2 + $0x90] sm:$0xff]  ;;  %v552_v36 = vld [vmem:[%s2038_s2 + $0x40] sm:$0xff]  ;;  %v1242_v37 = vld [vmem:[%s2038_s2 + $0x88] sm:$0xff]  ;;  %v533_v59 = vstv %s253_s6 }
  0x26   : > { %1414 = vmatprep.subr.mxu1 %v1214_v12  ;;  %1451 = vmatpush3.msra.mxu0 %v1227_v13  ;;  %v551_v38 = vld [vmem:[%s2038_s2 + $0x38] sm:$0xff]  ;;  %v1241_v39 = vld [vmem:[%s2038_s2 + $0x80] sm:$0xff]  ;;  %v550_v40 = vld [vmem:[%s2038_s2 + $0x30] sm:$0xff] }
  0x27   : > { %1415 = vmatpush3.msra.mxu1 %v1214_v12  ;;  %1452 = vmatprep.subr.mxu0 %v1226_v15  ;;  %v1240_v41 = vld [vmem:[%s2038_s2 + $0x78] sm:$0xff]  ;;  %v549_v42 = vld [vmem:[%s2038_s2 + $0x28] sm:$0xff]  ;;  %v1239_v43 = vld [vmem:[%s2038_s2 + $0x70] sm:$0xff] }
  0x28   : > { %1416 = vmatprep.subr.mxu1 %v1213_v14  ;;  %v264_v17 = vld [vmem:[#allocation2 + $0x1] sm:$0xff]  ;;  %v265_v18 = vld [vmem:[#allocation2 + $0x9] sm:$0xff]  ;;  %1453 = vmatpush3.msra.mxu0 %v1226_v15  ;;  %v547_v46 = vld [vmem:[%s2038_s2 + $0x18] sm:$0xff] }
  0x29   : > { %1417 = vmatpush3.msra.mxu1 %v1213_v14  ;;  %1420 = vmatprep.mubr.msk.f32.mxu1 %vm250_vm1, %v264_v17  ;;  %v254_v24 = vld [vmem:[#allocation2] sm:$0xff]  ;;  %v438_v27 = vld [vmem:[#allocation2 + $0xa] sm:$0xff]  ;;  %v1236_v49 = vld [vmem:[%s2038_s2 + $0x58] sm:$0xff] }
  0x2a   : > { %1418 = vmatprep.subr.mxu1 %v1212_v16  ;;  %1454 = vmatprep.subr.mxu0 %v1225_v20  ;;  %v437_v26 = vld [vmem:[#allocation2 + $0x2] sm:$0xff]  ;;  %v546_v48 = vld [vmem:[%s2038_s2 + $0x10] sm:$0xff]  ;;  %v1256_v12 = vld [vmem:[%s2038_s2 + $0xd8] sm:$0xff] }
  0x2b   : > { %1419 = vmatpush3.msra.mxu1 %v1212_v16  ;;  %1455 = vmatpush3.msra.mxu0 %v1225_v20  ;;  %v255_v32 = vld [vmem:[#allocation2 + $0x8] sm:$0xff]  ;;  %v548_v44 = vld [vmem:[%s2038_s2 + $0x20] sm:$0xff]  ;;  %v1235_v51 = vld [vmem:[%s2038_s2 + $0x50] sm:$0xff] }
  0x2c   : > { %1421 = vmatmul.mubr.msk.f32.vlgmr.msra.gmra.mxu1 %vm250_vm1, %v265_v18  ;;  %1423 = vmatprep.subr.mxu1 %v263_v19  ;;  %v1238_v45 = vld [vmem:[%s2038_s2 + $0x68] sm:$0xff]  ;;  %v1237_v47 = vld [vmem:[%s2038_s2 + $0x60] sm:$0xff]  ;;  %v1255_v13 = vld [vmem:[%s2038_s2 + $0xd0] sm:$0xff] }
  0x2d   : > { %1424 = vmatpush3.msra.mxu1 %v263_v19  ;;  %1456 = vmatprep.subr.mxu0 %v1224_v22  ;;  %v545_v50 = vld [vmem:[%s2038_s2 + $0x8] sm:$0xff]  ;;  %v544_v52 = vld [vmem:[%s2038_s2] sm:$0xff]  ;;  %v1252_v16 = vld [vmem:[%s2038_s2 + $0xb8] sm:$0xff] }
  0x2e   : > { %1425 = vmatprep.subr.mxu1 %v262_v21  ;;  %1439 = vmatprep.mubr.msk.f32.mxu1 %vm250_vm1, %v254_v24  ;;  %v1258_v53 = vld [vmem:[%s2038_s2 + $0xe8] sm:$0xff]  ;;  %v1257_v10 = vld [vmem:[%s2038_s2 + $0xe0] sm:$0xff]  ;;  %v1251_v17 = vld [vmem:[%s2038_s2 + $0xb0] sm:$0xff] }
  0x2f   : > { %1426 = vmatpush3.msra.mxu1 %v262_v21  ;;  %1457 = vmatpush3.msra.mxu0 %v1224_v22  ;;  %v1254_v14 = vld [vmem:[%s2038_s2 + $0xc8] sm:$0xff]  ;;  %v1253_v15 = vld [vmem:[%s2038_s2 + $0xc0] sm:$0xff]  ;;  %v1273_v21 = vld [vmem:[%s2039_s3 + $0xb8] sm:$0xff] }
  0x30   : > { %1427 = vmatprep.subr.mxu1 %v261_v23  ;;  %1458 = vmatprep.mubr.msk.f32.mxu0 %vm250_vm1, %v437_v26  ;;  %v1250_v18 = vld [vmem:[%s2038_s2 + $0xa8] sm:$0xff]  ;;  %v1249_v19 = vld [vmem:[%s2038_s2 + $0xa0] sm:$0xff]  ;;  %v849_v22 = vld [vmem:[%s2039_s3 + $0x58] sm:$0xff] }
  0x31   : > { %1428 = vmatpush3.msra.mxu1 %v261_v23  ;;  %1459 = vmatmul.mubr.msk.f32.vlgmr.msra.gmra.mxu0 %vm250_vm1, %v438_v27  ;;  %v1272_v23 = vld [vmem:[%s2039_s3 + $0xb0] sm:$0xff]  ;;  %v847_v26 = vld [vmem:[%s2039_s3 + $0x48] sm:$0xff]  ;;  %v1270_v27 = vld [vmem:[%s2039_s3 + $0xa0] sm:$0xff] }
  0x32   : > { %1429 = vmatprep.subr.mxu1 %v260_v25  ;;  %1484 = vmatprep.subr.mxu0 %v553_v34  ;;  %v848_v24 = vld [vmem:[%s2039_s3 + $0x50] sm:$0xff] }
  0x33   : > { %1430 = vmatpush3.msra.mxu1 %v260_v25  ;;  %1485 = vmatpush3.msra.mxu0 %v553_v34  ;;  %v1271_v25 = vld [vmem:[%s2039_s3 + $0xa8] sm:$0xff]  ;;  %v840_v3 = vld [vmem:[%s2039_s3 + $0x10] sm:$0xff] }
  0x34   : > { %1431 = vmatprep.subr.mxu1 %v259_v28  ;;  %1486 = vmatprep.subr.mxu0 %v552_v36  ;;  %v843_v34 = vld [vmem:[%s2039_s3 + $0x28] sm:$0xff] }
  0x35   : > { %1432 = vmatpush3.msra.mxu1 %v259_v28  ;;  %1487 = vmatpush3.msra.mxu0 %v552_v36  ;;  %v846_v28 = vld [vmem:[%s2039_s3 + $0x40] sm:$0xff] }
  0x36   : > { %1433 = vmatprep.subr.mxu1 %v258_v29  ;;  %1488 = vmatprep.subr.mxu0 %v551_v38  ;;  %v842_v36 = vld [vmem:[%s2039_s3 + $0x20] sm:$0xff] }
  0x37   : > { %1434 = vmatpush3.msra.mxu1 %v258_v29  ;;  %1489 = vmatpush3.msra.mxu0 %v551_v38  ;;  %v1269_v29 = vld [vmem:[%s2039_s3 + $0x98] sm:$0xff] }
  0x38   : > { %1435 = vmatprep.subr.mxu1 %v257_v30  ;;  %1490 = vmatprep.subr.mxu0 %v550_v40  ;;  %v841_v38 = vld [vmem:[%s2039_s3 + $0x18] sm:$0xff] }
  0x39   : > { %1436 = vmatpush3.msra.mxu1 %v257_v30  ;;  %1491 = vmatpush3.msra.mxu0 %v550_v40  ;;  %v845_v30 = vld [vmem:[%s2039_s3 + $0x38] sm:$0xff]  ;;  %v1263_v40 = vld [vmem:[%s2039_s3 + $0x68] sm:$0xff] }
  0x3a   : > { %1437 = vmatprep.subr.mxu1 %v256_v31  ;;  %1492 = vmatprep.subr.mxu0 %v549_v42 }
  0x3b   : > { %1438 = vmatpush3.msra.mxu1 %v256_v31  ;;  %1493 = vmatpush3.msra.mxu0 %v549_v42  ;;  %v1268_v31 = vld [vmem:[%s2039_s3 + $0x90] sm:$0xff]  ;;  %v1262_v42 = vld [vmem:[%s2039_s3 + $0x60] sm:$0xff] }
  0x3c   : > { %1440 = vmatmul.mubr.msk.f32.vlgmr.msra.gmra.mxu1 %vm250_vm1, %v255_v32  ;;  %1461 = vmatprep.subr.mxu1 %v1244_v33  ;;  %v844_v32 = vld [vmem:[%s2039_s3 + $0x30] sm:$0xff] }
  0x3d   : > { %1462 = vmatpush3.msra.mxu1 %v1244_v33  ;;  %1494 = vmatprep.subr.mxu0 %v548_v44  ;;  %v1267_v33 = vld [vmem:[%s2039_s3 + $0x88] sm:$0xff] }
  0x3e   : > { %1463 = vmatprep.subr.mxu1 %v1243_v35  ;;  %1495 = vmatpush3.msra.mxu0 %v548_v44  ;;  %v1289_v44 = vld [vmem:[%s2039_s3 + $0x118] sm:$0xff] }
  0x3f   : > { %1464 = vmatpush3.msra.mxu1 %v1243_v35  ;;  %1496 = vmatprep.subr.mxu0 %v547_v46  ;;  %v1266_v35 = vld [vmem:[%s2039_s3 + $0x80] sm:$0xff] }
  0x40   : > { %1465 = vmatprep.subr.mxu1 %v1242_v37  ;;  %1497 = vmatpush3.msra.mxu0 %v547_v46 }
  0x41   : > { %1466 = vmatpush3.msra.mxu1 %v1242_v37  ;;  %1498 = vmatprep.subr.mxu0 %v546_v48  ;;  %v1265_v37 = vld [vmem:[%s2039_s3 + $0x78] sm:$0xff] }
  0x42   : > { %1467 = vmatprep.subr.mxu1 %v1241_v39  ;;  %1499 = vmatpush3.msra.mxu0 %v546_v48 }
  0x43   : > { %1468 = vmatpush3.msra.mxu1 %v1241_v39  ;;  %1500 = vmatprep.subr.mxu0 %v545_v50  ;;  %v1264_v39 = vld [vmem:[%s2039_s3 + $0x70] sm:$0xff] }
  0x44   : > { %1469 = vmatprep.subr.mxu1 %v1240_v41  ;;  %1501 = vmatpush3.msra.mxu0 %v545_v50 }
  0x45   : > { %1470 = vmatpush3.msra.mxu1 %v1240_v41  ;;  %1502 = vmatprep.subr.mxu0 %v544_v52  ;;  %v839_v41 = vld [vmem:[%s2039_s3 + $0x8] sm:$0xff] }
  0x46   : > { %1471 = vmatprep.subr.mxu1 %v1239_v43  ;;  %1503 = vmatpush3.msra.mxu0 %v544_v52 }
  0x47   : > { %1472 = vmatpush3.msra.mxu1 %v1239_v43  ;;  %1530 = vmatprep.subr.mxu0 %v1273_v21  ;;  %v838_v43 = vld [vmem:[%s2039_s3] sm:$0xff] }
  0x48   : > { %1473 = vmatprep.subr.mxu1 %v1238_v45 }
  0x49   : > { %1474 = vmatpush3.msra.mxu1 %v1238_v45 }
  0x4a   : > { %1475 = vmatprep.subr.mxu1 %v1237_v47 }
  0x4b   : > { %1476 = vmatpush3.msra.mxu1 %v1237_v47 }
  0x4c   : > { %1477 = vmatprep.subr.mxu1 %v1236_v49 }
  0x4d   : > { %1478 = vmatpush3.msra.mxu1 %v1236_v49 }
  0x4e   : > { %1479 = vmatprep.subr.mxu1 %v1235_v51 }
  0x4f   : > { %1480 = vmatpush3.msra.mxu1 %v1235_v51  ;;  %v827_v51 = vstv %s1234_s9 }
  0x50   : > { %1507 = vmatprep.subr.mxu1 %v1258_v53 }
  0xec   : > { %v1422_v54 = vpop.f32.mrf.mxu1 }
  0xee   : > { %v347_v55 = vpop.f32.mrf.mxu1 }
  0xf1   : > { %v1460_v57 = vpop.f32.mrf.mxu0 }
  0xf3   : > { %v520_v63 = vpop.f32.mrf.mxu0 }
  0xfc   : > { %v1441_v56 = vpop.f32.mrf.mxu1 }
  0xfd   : > { %v434_v58 = vadd.f32 %v1441_v56, %v1422_v54 }
  0xfe   : > { %v428_v60 = vpop.f32.mrf.mxu1 }
  0xff   : > { %v530_v61 = vadd.f32 %v1460_v57, %v434_v58  ;;  %v429_v62 = vadd.f32 %v428_v60, %v347_v55 }
 0x101   : > { %vm532_vm3 = vcmp.gt.f32.partialorder %v530_v61, 0.0  ;;  %v535_v0 = vmul.f32 %v533_v59, %v530_v61  ;;  %v529_v1 = vadd.f32 %v520_v63, %v429_v62 }
 0x103   : > { %v537_v2 = vsel %vm532_vm3, %v530_v61, %v535_v0  ;;  %vm531_vm5 = vcmp.gt.f32.partialorder %v529_v1, 0.0  ;;  %v534_v4 = vmul.f32 %v533_v59, %v529_v1  ;;  %v1288_v0 = vld [vmem:[%s2039_s3 + $0x110] sm:$0xff] }
 0x104   : > { %540 = vst.msk [vmem:[#allocation3 + $0x9] sm:$0xff] %vm538_vm4, %v537_v2  ;;  %v1287_v2 = vld [vmem:[%s2039_s3 + $0x108] sm:$0xff] }
 0x105   : > { %v536_v5 = vsel %vm531_vm5, %v529_v1, %v534_v4  ;;  %v1286_v4 = vld [vmem:[%s2039_s3 + $0x100] sm:$0xff] }
 0x106   : > { %539 = vst.msk [vmem:[#allocation3 + $0x1] sm:$0xff] %vm538_vm4, %v536_v5  ;;  %v1285_v5 = vld [vmem:[%s2039_s3 + $0xf8] sm:$0xff] }
 0x10b   : > { %v555_v9 = vld [vmem:[#allocation3 + $0x9] sm:$0xff] }
 0x10c   : > { %v730_v20 = vld [vmem:[#allocation3 + $0xa] sm:$0xff] }
 0x10d   : > { %v554_v6 = vld [vmem:[#allocation3 + $0x1] sm:$0xff] }
 0x10e   : > { %v542_v7 = vld [vmem:[#allocation3] sm:$0xff]  ;;  %v543_v8 = vld [vmem:[#allocation3 + $0x8] sm:$0xff]  ;;  %1481 = vmatprep.mubr.msk.f32.mxu1 %vm538_vm4, %v554_v6  ;;  %v1284_v6 = vld [vmem:[%s2039_s3 + $0xf0] sm:$0xff] }
 0x10f   : > { %1504 = vmatprep.mubr.msk.f32.mxu0 %vm538_vm4, %v542_v7  ;;  %1482 = vmatmul.mubr.msk.f32.vlgmr.msra.gmra.mxu1 %vm538_vm4, %v555_v9  ;;  %v729_v11 = vld [vmem:[#allocation3 + $0x2] sm:$0xff]  ;;  %v1283_v7 = vld [vmem:[%s2039_s3 + $0xe8] sm:$0xff] }
 0x110   : > { %1505 = vmatmul.mubr.msk.f32.vlgmr.msra.gmra.mxu0 %vm538_vm4, %v543_v8  ;;  %1508 = vmatpush3.msra.mxu1 %v1258_v53  ;;  %v1282_v8 = vld [vmem:[%s2039_s3 + $0xe0] sm:$0xff]  ;;  %v1281_v9 = vld [vmem:[%s2039_s3 + $0xd8] sm:$0xff] }
 0x111   : > { %1527 = vmatprep.mubr.msk.f32.mxu1 %vm538_vm4, %v729_v11  ;;  %1509 = vmatprep.subr.mxu1 %v1257_v10  ;;  %v1279_v11 = vld [vmem:[%s2039_s3 + $0xc8] sm:$0xff] }
 0x112   : > { %1510 = vmatpush3.msra.mxu1 %v1257_v10  ;;  %1531 = vmatpush3.msra.mxu0 %v1273_v21  ;;  %v1280_v10 = vld [vmem:[%s2039_s3 + $0xd0] sm:$0xff] }
 0x113   : > { %1511 = vmatprep.subr.mxu1 %v1256_v12  ;;  %1532 = vmatprep.subr.mxu0 %v1272_v23 }
 0x114   : > { %1512 = vmatpush3.msra.mxu1 %v1256_v12  ;;  %1533 = vmatpush3.msra.mxu0 %v1272_v23  ;;  %v1278_v12 = vld [vmem:[%s2039_s3 + $0xc0] sm:$0xff] }
 0x115   : > { %1513 = vmatprep.subr.mxu1 %v1255_v13  ;;  %1534 = vmatprep.subr.mxu0 %v1271_v25 }
 0x116   : > { %1514 = vmatpush3.msra.mxu1 %v1255_v13  ;;  %1535 = vmatpush3.msra.mxu0 %v1271_v25 }
 0x117   : > { %1515 = vmatprep.subr.mxu1 %v1254_v14  ;;  %1536 = vmatprep.subr.mxu0 %v1270_v27 }
 0x118   : > { %1516 = vmatpush3.msra.mxu1 %v1254_v14  ;;  %1537 = vmatpush3.msra.mxu0 %v1270_v27 }
 0x119   : > { %1517 = vmatprep.subr.mxu1 %v1253_v15  ;;  %1538 = vmatprep.subr.mxu0 %v1269_v29 }
 0x11a   : > { %1518 = vmatpush3.msra.mxu1 %v1253_v15  ;;  %1539 = vmatpush3.msra.mxu0 %v1269_v29 }
 0x11b   : > { %1519 = vmatprep.subr.mxu1 %v1252_v16  ;;  %1540 = vmatprep.subr.mxu0 %v1268_v31 }
 0x11c   : > { %1520 = vmatpush3.msra.mxu1 %v1252_v16  ;;  %1541 = vmatpush3.msra.mxu0 %v1268_v31 }
 0x11d   : > { %1521 = vmatprep.subr.mxu1 %v1251_v17  ;;  %1542 = vmatprep.subr.mxu0 %v1267_v33 }
 0x11e   : > { %1522 = vmatpush3.msra.mxu1 %v1251_v17  ;;  %1543 = vmatpush3.msra.mxu0 %v1267_v33 }
 0x11f   : > { %1523 = vmatprep.subr.mxu1 %v1250_v18  ;;  %1544 = vmatprep.subr.mxu0 %v1266_v35 }
 0x120   : > { %1524 = vmatpush3.msra.mxu1 %v1250_v18  ;;  %1545 = vmatpush3.msra.mxu0 %v1266_v35 }
 0x121   : > { %1525 = vmatprep.subr.mxu1 %v1249_v19  ;;  %1546 = vmatprep.subr.mxu0 %v1265_v37 }
 0x122   : > { %1526 = vmatpush3.msra.mxu1 %v1249_v19  ;;  %1547 = vmatpush3.msra.mxu0 %v1265_v37 }
 0x123   : > { %1528 = vmatmul.mubr.msk.f32.vlgmr.msra.gmra.mxu1 %vm538_vm4, %v730_v20  ;;  %1557 = vmatprep.subr.mxu1 %v849_v22  ;;  %v1127_v20 = vstv %s1261_s10 }
 0x124   : > { %1558 = vmatpush3.msra.mxu1 %v849_v22  ;;  %1548 = vmatprep.subr.mxu0 %v1264_v39 }
 0x125   : > { %1559 = vmatprep.subr.mxu1 %v848_v24  ;;  %1549 = vmatpush3.msra.mxu0 %v1264_v39 }
 0x126   : > { %1560 = vmatpush3.msra.mxu1 %v848_v24  ;;  %1550 = vmatprep.subr.mxu0 %v1263_v40 }
 0x127   : > { %1561 = vmatprep.subr.mxu1 %v847_v26  ;;  %1551 = vmatpush3.msra.mxu0 %v1263_v40 }
 0x128   : > { %1562 = vmatpush3.msra.mxu1 %v847_v26  ;;  %1552 = vmatprep.subr.mxu0 %v1262_v42 }
 0x129   : > { %1563 = vmatprep.subr.mxu1 %v846_v28  ;;  %1553 = vmatpush3.msra.mxu0 %v1262_v42 }
 0x12a   : > { %1564 = vmatpush3.msra.mxu1 %v846_v28  ;;  %1584 = vmatprep.subr.mxu0 %v1289_v44 }
 0x12b   : > { %1565 = vmatprep.subr.mxu1 %v845_v30 }
 0x12c   : > { %1566 = vmatpush3.msra.mxu1 %v845_v30 }
 0x12d   : > { %1567 = vmatprep.subr.mxu1 %v844_v32 }
 0x12e   : > { %1568 = vmatpush3.msra.mxu1 %v844_v32 }
 0x12f   : > { %1569 = vmatprep.subr.mxu1 %v843_v34 }
 0x130   : > { %1570 = vmatpush3.msra.mxu1 %v843_v34 }
 0x131   : > { %1571 = vmatprep.subr.mxu1 %v842_v36 }
 0x132   : > { %1572 = vmatpush3.msra.mxu1 %v842_v36 }
 0x133   : > { %1573 = vmatprep.subr.mxu1 %v841_v38 }
 0x134   : > { %1574 = vmatpush3.msra.mxu1 %v841_v38 }
 0x135   : > { %1575 = vmatprep.subr.mxu1 %v840_v3 }
 0x136   : > { %1576 = vmatpush3.msra.mxu1 %v840_v3 }
 0x137   : > { %1577 = vmatprep.subr.mxu1 %v839_v41 }
 0x138   : > { %1578 = vmatpush3.msra.mxu1 %v839_v41 }
 0x139   : > { %1579 = vmatprep.subr.mxu1 %v838_v43 }
 0x13a   : > { %1580 = vmatpush3.msra.mxu1 %v838_v43 }
 0x1cf   : > { %v1483_v45 = vpop.f32.mrf.mxu1 }
 0x1d0   : > { %v1506_v46 = vpop.f32.mrf.mxu0 }
 0x1d1   : > { %v639_v47 = vpop.f32.mrf.mxu1  ;;  %v726_v49 = vadd.f32 %v1506_v46, %v1483_v45 }
 0x1d2   : > { %v720_v48 = vpop.f32.mrf.mxu0 }
 0x1d3   : > { %v721_v52 = vadd.f32 %v720_v48, %v639_v47 }
 0x1e3   : > { %v1529_v50 = vpop.f32.mrf.mxu1 }
 0x1e4   : > { %v824_v53 = vadd.f32 %v1529_v50, %v726_v49 }
 0x1e5   : > { %v814_v54 = vpop.f32.mrf.mxu1 }
 0x1e6   : > { %vm826_vm7 = vcmp.gt.f32.partialorder %v824_v53, 0.0  ;;  %v829_v55 = vmul.f32 %v827_v51, %v824_v53  ;;  %v823_v56 = vadd.f32 %v814_v54, %v721_v52 }
 0x1e8   : > { %v831_v57 = vsel %vm826_vm7, %v824_v53, %v829_v55  ;;  %vm825_vm9 = vcmp.gt.f32.partialorder %v823_v56, 0.0  ;;  %v828_v58 = vmul.f32 %v827_v51, %v823_v56 }
 0x1e9   : > { %834 = vst.msk [vmem:[#allocation4 + $0x9] sm:$0xff] %vm832_vm8, %v831_v57 }
 0x1ea   : > { %v830_v59 = vsel %vm825_vm9, %v823_v56, %v828_v58 }
 0x1eb   : > { %833 = vst.msk [vmem:[#allocation4 + $0x1] sm:$0xff] %vm832_vm8, %v830_v59 }
 0x1f0   : > { %v851_v63 = vld [vmem:[#allocation4 + $0x9] sm:$0xff] }
 0x1f1   : > { %v1028_v13 = vld [vmem:[#allocation4 + $0xa] sm:$0xff] }
 0x1f2   : > { %v850_v60 = vld [vmem:[#allocation4 + $0x1] sm:$0xff] }
 0x1f3   : > { %v836_v61 = vld [vmem:[#allocation4] sm:$0xff]  ;;  %v837_v62 = vld [vmem:[#allocation4 + $0x8] sm:$0xff]  ;;  %1554 = vmatprep.mubr.msk.f32.mxu0 %vm832_vm8, %v850_v60 }
 0x1f4   : > { %1581 = vmatprep.mubr.msk.f32.mxu1 %vm832_vm8, %v836_v61  ;;  %1555 = vmatmul.mubr.msk.f32.vlgmr.msra.gmra.mxu0 %vm832_vm8, %v851_v63  ;;  %v1027_v1 = vld [vmem:[#allocation4 + $0x2] sm:$0xff] }
 0x1f5   : > { %1582 = vmatmul.mubr.msk.f32.vlgmr.msra.gmra.mxu1 %vm832_vm8, %v837_v62  ;;  %1585 = vmatpush3.msra.mxu0 %v1289_v44 }
 0x1f6   : > { %1608 = vmatprep.mubr.msk.f32.mxu0 %vm832_vm8, %v1027_v1  ;;  %1586 = vmatprep.subr.mxu0 %v1288_v0 }
 0x1f7   : > { %1587 = vmatpush3.msra.mxu0 %v1288_v0 }
 0x1f8   : > { %1588 = vmatprep.subr.mxu0 %v1287_v2 }
 0x1f9   : > { %1589 = vmatpush3.msra.mxu0 %v1287_v2 }
 0x1fa   : > { %1590 = vmatprep.subr.mxu0 %v1286_v4 }
 0x1fb   : > { %1591 = vmatpush3.msra.mxu0 %v1286_v4 }
 0x1fc   : > { %1592 = vmatprep.subr.mxu0 %v1285_v5 }
 0x1fd   : > { %1593 = vmatpush3.msra.mxu0 %v1285_v5 }
 0x1fe   : > { %1594 = vmatprep.subr.mxu0 %v1284_v6 }
 0x1ff   : > { %1595 = vmatpush3.msra.mxu0 %v1284_v6 }
 0x200   : > { %1596 = vmatprep.subr.mxu0 %v1283_v7 }
 0x201   : > { %1597 = vmatpush3.msra.mxu0 %v1283_v7 }
 0x202   : > { %1598 = vmatprep.subr.mxu0 %v1282_v8 }
 0x203   : > { %1599 = vmatpush3.msra.mxu0 %v1282_v8 }
 0x204   : > { %1600 = vmatprep.subr.mxu0 %v1281_v9 }
 0x205   : > { %1601 = vmatpush3.msra.mxu0 %v1281_v9 }
 0x206   : > { %1602 = vmatprep.subr.mxu0 %v1280_v10 }
 0x207   : > { %1603 = vmatpush3.msra.mxu0 %v1280_v10 }
 0x208   : > { %1604 = vmatprep.subr.mxu0 %v1279_v11 }
 0x209   : > { %1605 = vmatpush3.msra.mxu0 %v1279_v11 }
 0x20a   : > { %1606 = vmatprep.subr.mxu0 %v1278_v12 }
 0x20b   : > { %1607 = vmatpush3.msra.mxu0 %v1278_v12 }
 0x20c   : > { %1609 = vmatmul.mubr.msk.f32.vlgmr.msra.gmra.mxu0 %vm832_vm8, %v1028_v13 }
 0x2b4   : > { %v1556_v14 = vpop.f32.mrf.mxu0 }
 0x2b5   : > { %v1583_v15 = vpop.f32.mrf.mxu1 }
 0x2b6   : > { %v937_v16 = vpop.f32.mrf.mxu0  ;;  %v1024_v18 = vadd.f32 %v1583_v15, %v1556_v14 }
 0x2b7   : > { %v1018_v17 = vpop.f32.mrf.mxu1 }
 0x2b8   : > { %v1019_v21 = vadd.f32 %v1018_v17, %v937_v16 }
 0x2cc   : > { %v1610_v19 = vpop.f32.mrf.mxu0 }
 0x2cd   : > { %v1124_v22 = vadd.f32 %v1610_v19, %v1024_v18 }
 0x2ce   : > { %v1114_v23 = vpop.f32.mrf.mxu0 }
 0x2cf   : > { %vm1126_vm10 = vcmp.gt.f32.partialorder %v1124_v22, 0.0  ;;  %v1129_v24 = vmul.f32 %v1127_v20, %v1124_v22  ;;  %v1123_v25 = vadd.f32 %v1114_v23, %v1019_v21 }
 0x2d1   : > { %v1131_v26 = vsel %vm1126_vm10, %v1124_v22, %v1129_v24  ;;  %vm1125_vm11 = vcmp.gt.f32.partialorder %v1123_v25, 0.0  ;;  %v1128_v27 = vmul.f32 %v1127_v20, %v1123_v25 }
 0x2d2   : > { %1133 = vst [vmem:[%s238_s14 + $0x8] sm:$0xff] %v1131_v26 }
 0x2d3   : > { %v1130_v28 = vsel %vm1125_vm11, %v1123_v25, %v1128_v27 }
 0x2d4   : > { %1132 = vst [vmem:[%s238_s14] sm:$0xff] %v1130_v28 }
 0x2d5 PF: > { %s16_s18 = sadd.s32 1, %s1656_s18  }
 0x2d6   : > { %p13_p1 = scmp.ge.s32.totalorder %s16_s18, 4  }
 0x2d8   :  { %15 = sbr.rel (!%p13_p1) target bundleno = 1 (0x1), region = 81 }
 0x2dd   :  { %1155 = vsyncpa [#allocation6], 1 }
 0x2de   :  { %1157 = vsyncpa [#allocation6 + $0x1], 1 }

</bundles_post_ra>
